<compile_context>
chip_gen: v5e
topology: v5e:2x2
jax: 0.10.0
libtpu: 0.0.40
codegen_flags: <defaults>
</compile_context>

<pallas_src>
import functools

import jax
import jax.numpy as jnp
from jax import lax
from jax.experimental import pallas as pl
from jax.experimental.pallas import tpu as pltpu


def _instance_norm_kernel(x_ref, o_ref, *, eps):
    # x_ref / o_ref: VMEM f32[rows, H*W]; one row == one (n, c) instance.
    x = x_ref[...].astype(jnp.float32)
    mean = jnp.mean(x, axis=-1, keepdims=True)
    xc = x - mean
    var = jnp.mean(xc * xc, axis=-1, keepdims=True)       # biased var (matches torch)
    o_ref[...] = (xc * lax.rsqrt(var + jnp.float32(eps))).astype(o_ref.dtype)


def _row_block(nc):
    """Rows per block: full extent if NC isn't 8-aligned, else a divisor of NC
    that is a multiple of 8 and <= 256."""
    if nc % 8 != 0:
        return nc
    tr = min(nc, 256)
    while nc % tr != 0:
        tr -= 8
    return tr


def instance_norm_2d(x, eps=1e-5):
    """x: f32[N, C, H, W]  ->  f32[N, C, H, W] (per-(n,c) spatial normalization)."""
    n, c, h, w = x.shape
    nc, hw = n * c, h * w
    x2 = x.reshape(nc, hw)

    kernel = functools.partial(_instance_norm_kernel, eps=eps)
    tr = _row_block(nc)
    nblocks = nc // tr

    if nblocks == 1:
        # Single invocation, full-array blocks: no grid / pipeline machinery.
        out = pl.pallas_call(
            kernel,
            out_shape=jax.ShapeDtypeStruct((nc, hw), x.dtype),
        )(x2)
    else:
        out = pl.pallas_call(
            kernel,
            out_shape=jax.ShapeDtypeStruct((nc, hw), x.dtype),
            grid=(nblocks,),
            in_specs=[pl.BlockSpec((tr, hw), lambda i: (i, 0))],
            out_specs=pl.BlockSpec((tr, hw), lambda i: (i, 0)),
            compiler_params=pltpu.CompilerParams(
                dimension_semantics=("parallel",)),
        )(x2)

    return out.reshape(n, c, h, w)


if __name__ == "__main__":
    key = jax.random.PRNGKey(0)
    N, C, H, W = 2, 4, 16, 16
    x = jax.random.normal(key, (N, C, H, W), dtype=jnp.float32) * 2.0 + 0.5

    y = instance_norm_2d(x)
    y = jax.block_until_ready(y)

    # Pure-JAX reference of torch.nn.InstanceNorm2d(affine=False) forward.
    mean = jnp.mean(x, axis=(2, 3), keepdims=True)
    var = jnp.mean((x - mean) ** 2, axis=(2, 3), keepdims=True)
    ref = (x - mean) / jnp.sqrt(var + 1e-5)

    assert y.shape == x.shape, y.shape
    assert y.dtype == x.dtype, y.dtype
    assert jnp.allclose(y, ref, rtol=1e-5, atol=1e-5), float(jnp.max(jnp.abs(y - ref)))

    print("KERNEL_OK")
</pallas_src>

<mosaic_0001>
module attributes {stable_mosaic.version = 11 : i64} {
  func.func @_instance_norm_kernel(%arg0: memref<8x256xf32, #tpu.memory_space<vmem>>, %arg1: memref<8x256xf32, #tpu.memory_space<vmem>>) attributes {dimension_semantics = [], scalar_prefetch = 0 : i64, scratch_operands = 0 : i64, tpu.core_type = #tpu.core_type<tc>} {
    %c0 = arith.constant 0 : index
    %c0_0 = arith.constant 0 : index
    %0 = vector.load %arg0[%c0, %c0_0] : memref<8x256xf32, #tpu.memory_space<vmem>>, vector<8x256xf32>
    %cst = arith.constant dense<0.000000e+00> : vector<8xf32>
    %1 = vector.multi_reduction <add>, %0, %cst [1] : vector<8x256xf32> to vector<8xf32>
    %2 = vector.shape_cast %1 : vector<8xf32> to vector<8x1xf32>
    %cst_1 = arith.constant 2.560000e+02 : f32
    %3 = vector.broadcast %cst_1 : f32 to vector<8x1xf32>
    %4 = arith.divf %2, %3 : vector<8x1xf32>
    %5 = vector.broadcast %4 : vector<8x1xf32> to vector<8x256xf32>
    %6 = arith.subf %0, %5 : vector<8x256xf32>
    %7 = arith.mulf %6, %6 : vector<8x256xf32>
    %cst_2 = arith.constant dense<0.000000e+00> : vector<8xf32>
    %8 = vector.multi_reduction <add>, %7, %cst_2 [1] : vector<8x256xf32> to vector<8xf32>
    %9 = vector.shape_cast %8 : vector<8xf32> to vector<8x1xf32>
    %cst_3 = arith.constant 2.560000e+02 : f32
    %10 = vector.broadcast %cst_3 : f32 to vector<8x1xf32>
    %11 = arith.divf %9, %10 : vector<8x1xf32>
    %cst_4 = arith.constant 9.99999974E-6 : f32
    %12 = vector.broadcast %cst_4 : f32 to vector<8x1xf32>
    %13 = arith.addf %11, %12 : vector<8x1xf32>
    %14 = math.rsqrt %13 : vector<8x1xf32>
    %15 = vector.broadcast %14 : vector<8x1xf32> to vector<8x256xf32>
    %16 = arith.mulf %6, %15 : vector<8x256xf32>
    %c0_5 = arith.constant 0 : index
    %c0_6 = arith.constant 0 : index
    %17 = vector.load %arg1[%c0_5, %c0_6] : memref<8x256xf32, #tpu.memory_space<vmem>>, vector<8x256xf32>
    tpu.vector_store %arg1[%c0_5, %c0_6], %16 {strides = array<i32>} : memref<8x256xf32, #tpu.memory_space<vmem>>, vector<8x256xf32>,
    return
  }
}

</mosaic_0001>

<bundles_post_ra>
// kernel: tpu_custom_call.1
= control target key start
LH: loop header
LB: loop body
LE: loop exit
PB: predicated region body
PF: predicated region fallthrough
CT: control target
= control target key end

     0   :  { %6 = vsyncpa [#allocation3], 0  ;;  %s154_s0 = inlined_call_operand.hbm [shape: f32[8,256], index: 0, kind: input, shape index: {}]   ;;  %s155_s1 = inlined_call_operand.hbm [shape: f32[8,256], index: 1, kind: output, shape index: {}]  }
   0x1   :  { %7 = vsyncpa [#allocation4], 0  ;;  %s13_s8 = sshll.u32 %s154_s0, 4  ;;  %s135_s9 = smov [#allocation2]   ;;  %s14_s8 = int_to_ptr.hbm [resolvable:$true] %s13_s8 }
   0x2   :  { %s15_s10 = sshll.u32 %s135_s9, 4  ;;  %s16_s10 = int_to_ptr.vmem [resolvable:$true] %s15_s10 }
   0x3   :  { %18 = dma.hbm_to_vmem [thread:$0]  %s14_s8, 256, %s16_s10, [#allocation3]  }
   0x4   :  { %131 = dma.done.wait [#allocation3], 256  }
   0x5   :  { %132 = vsyncadd [#allocation3], 4294967040  ;;  %v23_v0 = vld [vmem:[#allocation2] sm:$0xff]  ;;  %v24_v1 = vld [vmem:[#allocation2 + $0x8] sm:$0xff]  ;;  %v136_v3 = vmov 256.0   ;;  %s137_s0 = smov [#allocation5]  }
   0x6   :  { %v25_v2 = vadd.f32 %v24_v1, %v23_v0  ;;  %79 = vrcp.f32 %v136_v3  ;;  %s64_s11 = sshll.u32 %s137_s0, 4  ;;  %s66_s14 = sshll.u32 %s155_s1, 4  ;;  %s65_s11 = int_to_ptr.vmem [resolvable:$true] %s64_s11  ;;  %s67_s14 = int_to_ptr.hbm [resolvable:$true] %s66_s14 }
   0x8   :  { %26 = vadd.xlane.f32.xlu0 %v25_v2 }
   0xc   :  { %v80_v4 = vpop.eup %79 }
   0xd   :  { %v29_v5 = vmul.f32 256.0, %v80_v4  ;;  %vm33_vm0 = vweird.f32 %v80_v4 }
   0xf   :  { %v30_v6 = vsub.f32 1.0, %v29_v5 }
  0x11   :  { %v31_v7 = vmul.f32 %v80_v4, %v30_v6 }
  0x13   :  { %v32_v8 = vadd.f32 %v80_v4, %v31_v7 }
  0x15   :  { %v34_v9 = vsel %vm33_vm0, %v80_v4, %v32_v8 }
  0x7b   :  { %v27_v10 = vpop.xlane.xlu0 %26 }
  0x7c   :  { %v35_v11 = vmul.f32 %v34_v9, %v27_v10 }
  0x7e   :  { %v36_v12 = vsub.f32 %v23_v0, %v35_v11  ;;  %v37_v13 = vsub.f32 %v24_v1, %v35_v11 }
  0x80   :  { %v38_v14 = vmul.f32 %v36_v12, %v36_v12  ;;  %v39_v15 = vmul.f32 %v37_v13, %v37_v13 }
  0x82   :  { %v40_v16 = vadd.f32 %v39_v15, %v38_v14 }
  0x84   :  { %41 = vadd.xlane.f32.xlu0 %v40_v16 }
  0xf7   :  { %v42_v17 = vpop.xlane.xlu0 %41 }
  0xf8   :  { %v43_v18 = vmul.f32 %v42_v17, %v34_v9 }
  0xfa   :  { %v44_v19 = vadd.f32 1e-05, %v43_v18 }
  0xfc   :  { %81 = vrsqrt.f32 %v44_v19  ;;  %vm51_vm2 = vweird.f32 %v44_v19 }
 0x102   :  { %v82_v20 = vpop.eup %81 }
 0x103   :  { %v46_v21 = vmul.f32 %v82_v20, %v44_v19  ;;  %vm52_vm1 = vweird.f32 %v82_v20 }
 0x104   :  { %vm53_vm3 = vmor %vm51_vm2, %vm52_vm1 }
 0x105   :  { %v47_v22 = vmul.f32 %v82_v20, %v46_v21 }
 0x107   :  { %v48_v23 = vmul.f32 0.5, %v47_v22 }
 0x109   :  { %v49_v24 = vsub.f32 1.5, %v48_v23 }
 0x10b   :  { %v50_v25 = vmul.f32 %v82_v20, %v49_v24 }
 0x10d   :  { %v54_v26 = vsel %vm53_vm3, %v82_v20, %v50_v25 }
 0x10e   :  { %v55_v27 = vmul.f32 %v54_v26, %v36_v12  ;;  %v56_v28 = vmul.f32 %v54_v26, %v37_v13 }
 0x110   :  { %57 = vst [vmem:[#allocation5] sm:$0xff] %v55_v27 }
 0x111   :  { %58 = vst [vmem:[#allocation5 + $0x8] sm:$0xff] %v56_v28 }
 0x112   :  { %69 = dma.vmem_to_hbm [thread:$0]  %s65_s11, 256, %s67_s14, [#allocation4]  }
 0x113   :  { %133 = dma.done.wait [#allocation4], 256  }
 0x114   :  { %134 = vsyncadd [#allocation4], 4294967040 }
 0x115   :  { %74 = vsyncpa [#allocation3], 1 }
 0x116   :  { %75 = vsyncpa [#allocation4], 1 }

</bundles_post_ra>
